<compile_context>
chip_gen: v7x
topology: tpu7x:2x2x1
jax: 0.10.0
libtpu: 0.0.40
codegen_flags: <defaults>
</compile_context>

<pallas_src>
import functools

import jax
import jax.numpy as jnp
import numpy as np
from jax.experimental import pallas as pl
from jax.experimental.pallas import tpu as pltpu

EPS = 1e-8


def _instance_norm_kernel(x_ref, o_ref, *, hw, hw_pad):
    # x_ref: (tile_rows, hw_pad) block; each row is one (b, c) instance.
    # Padded lanes/rows (if any) are zero in HBM; stats divide by the true hw.
    x = x_ref[...].astype(jnp.float32)
    if hw == hw_pad:
        mean = jnp.mean(x, axis=-1, keepdims=True)
        xc = x - mean
        var = jnp.mean(xc * xc, axis=-1, keepdims=True)
    else:
        inv_hw = jnp.float32(1.0 / hw)
        mean = jnp.sum(x, axis=-1, keepdims=True) * inv_hw  # pads are zero
        xc = x - mean
        lane = jax.lax.broadcasted_iota(jnp.int32, x.shape, dimension=x.ndim - 1)
        var = jnp.sum(jnp.where(lane < hw, xc * xc, 0.0),
                      axis=-1, keepdims=True) * inv_hw
    o_ref[...] = (xc * jax.lax.rsqrt(var + EPS)).astype(o_ref.dtype)


def _round_up(x, m):
    return ((x + m - 1) // m) * m


def _sublane_step(dtype):
    # Rows per vreg sublane group: 8 for 32-bit, 16 for bf16, 32 for int8/fp8.
    return max(8, 32 // max(jnp.dtype(dtype).itemsize, 1))


def _pick_row_tile(rows, hw_pad, dtype_bytes, row_step, target_bytes=4 << 20):
    """Fixed byte-budget row tile (multiple of row_step), capped at the problem
    size, never collapsing the grid to a single step when rows allow >= 2."""
    bytes_per_row = max(hw_pad * dtype_bytes, 1)
    tile = max(row_step, (target_bytes // bytes_per_row) // row_step * row_step)
    rows_aligned = _round_up(rows, row_step)
    tile = min(tile, rows_aligned)
    # v7x megacore: keep >= 2 grid steps when possible so the "parallel" axis
    # can shard row tiles across both TensorCores.
    if rows_aligned >= 2 * row_step and pl.cdiv(rows_aligned, tile) < 2:
        tile = _round_up(pl.cdiv(rows_aligned, 2), row_step)
    return tile


def instance_norm(x):
    b, c, h, w = x.shape
    rows, hw = b * c, h * w
    hw_pad = _round_up(hw, 128)                       # lane-dense stores

    row_step = _sublane_step(x.dtype)
    tile = _pick_row_tile(rows, hw_pad, x.dtype.itemsize, row_step)
    grid_n = pl.cdiv(rows, tile)
    rows_pad = grid_n * tile

    xf = x.reshape(rows, hw)
    if rows_pad != rows or hw_pad != hw:
        xf = jnp.pad(xf, ((0, rows_pad - rows), (0, hw_pad - hw)))

    kernel = functools.partial(_instance_norm_kernel, hw=hw, hw_pad=hw_pad)

    # TODO(synk): optionally sweep pipeline_mode=pl.Buffered(3) on in_specs for
    # a few extra percent on fast-HBM chips once VMEM headroom is confirmed.
    out = pl.pallas_call(
        kernel,
        out_shape=jax.ShapeDtypeStruct((rows_pad, hw_pad), x.dtype),
        grid_spec=pltpu.PrefetchScalarGridSpec(
            num_scalar_prefetch=0,
            grid=(grid_n,),
            in_specs=[pl.BlockSpec((tile, hw_pad), lambda i: (i, 0))],
            out_specs=pl.BlockSpec((tile, hw_pad), lambda i: (i, 0)),
        ),
        compiler_params=pltpu.CompilerParams(
            dimension_semantics=("parallel",),
            vmem_limit_bytes=48 * 1024 * 1024,
        ),
    )(xf)

    if rows_pad != rows or hw_pad != hw:
        out = out[:rows, :hw]
    return out.reshape(b, c, h, w)


def instance_norm_reference(x):
    xf = x.astype(jnp.float32)
    mean = jnp.mean(xf, axis=(2, 3), keepdims=True)
    xc = xf - mean
    var = jnp.mean(xc * xc, axis=(2, 3), keepdims=True)
    return (xc * jax.lax.rsqrt(var + EPS)).astype(x.dtype)


if __name__ == "__main__":
    B, C, H, W = 2, 4, 16, 16

    key = jax.random.PRNGKey(0)
    x = jax.random.normal(key, (B, C, H, W), jnp.float32)

    out = jax.block_until_ready(instance_norm(x))

    out_ref = instance_norm_reference(x)
    np.testing.assert_allclose(np.asarray(out), np.asarray(out_ref),
                               rtol=1e-5, atol=1e-5)

    print("KERNEL_OK")
</pallas_src>

<mosaic_0001>
module attributes {stable_mosaic.version = 11 : i64} {
  func.func @_instance_norm_kernel(%arg0: i32, %arg1: memref<8x256xf32, #tpu.memory_space<vmem>>, %arg2: memref<8x256xf32, #tpu.memory_space<vmem>>) attributes {dimension_semantics = [#tpu.dimension_semantics<parallel>], iteration_bounds = array<i64: 1>, scalar_prefetch = 0 : i64, scratch_operands = 0 : i64, tpu.core_type = #tpu.core_type<tc>, window_params = [{transform_indices = @transform_0, window_bounds = array<i64: 8, 256>}, {transform_indices = @transform_1, window_bounds = array<i64: 8, 256>}]} {
    %c0 = arith.constant 0 : index
    %c0_0 = arith.constant 0 : index
    %0 = vector.load %arg1[%c0, %c0_0] : memref<8x256xf32, #tpu.memory_space<vmem>>, vector<8x256xf32>
    %cst = arith.constant dense<0.000000e+00> : vector<8xf32>
    %1 = vector.multi_reduction <add>, %0, %cst [1] : vector<8x256xf32> to vector<8xf32>
    %2 = vector.shape_cast %1 : vector<8xf32> to vector<8x1xf32>
    %cst_1 = arith.constant 2.560000e+02 : f32
    %3 = vector.broadcast %cst_1 : f32 to vector<8x1xf32>
    %4 = arith.divf %2, %3 : vector<8x1xf32>
    %5 = vector.broadcast %4 : vector<8x1xf32> to vector<8x256xf32>
    %6 = arith.subf %0, %5 : vector<8x256xf32>
    %7 = arith.mulf %6, %6 : vector<8x256xf32>
    %cst_2 = arith.constant dense<0.000000e+00> : vector<8xf32>
    %8 = vector.multi_reduction <add>, %7, %cst_2 [1] : vector<8x256xf32> to vector<8xf32>
    %9 = vector.shape_cast %8 : vector<8xf32> to vector<8x1xf32>
    %cst_3 = arith.constant 2.560000e+02 : f32
    %10 = vector.broadcast %cst_3 : f32 to vector<8x1xf32>
    %11 = arith.divf %9, %10 : vector<8x1xf32>
    %cst_4 = arith.constant 9.99999993E-9 : f32
    %12 = vector.broadcast %cst_4 : f32 to vector<8x1xf32>
    %13 = arith.addf %11, %12 : vector<8x1xf32>
    %14 = math.rsqrt %13 : vector<8x1xf32>
    %15 = vector.broadcast %14 : vector<8x1xf32> to vector<8x256xf32>
    %16 = arith.mulf %6, %15 : vector<8x256xf32>
    %c0_5 = arith.constant 0 : index
    %c0_6 = arith.constant 0 : index
    %17 = vector.load %arg2[%c0_5, %c0_6] : memref<8x256xf32, #tpu.memory_space<vmem>>, vector<8x256xf32>
    tpu.vector_store %arg2[%c0_5, %c0_6], %16 {strides = array<i32>} : memref<8x256xf32, #tpu.memory_space<vmem>>, vector<8x256xf32>,
    return
  }
  func.func @transform_0(%arg0: i32) -> (i32, i32) {
    %c0_i32 = arith.constant 0 : i32
    %c0_i32_0 = arith.constant 0 : i32
    return %arg0, %c0_i32 : i32, i32
  }
  func.func @transform_1(%arg0: i32) -> (i32, i32) {
    %c0_i32 = arith.constant 0 : i32
    %c0_i32_0 = arith.constant 0 : i32
    return %arg0, %c0_i32 : i32, i32
  }
}

</mosaic_0001>

<bundles_post_ra>
// kernel: tpu_custom_call.1
= control target key start
LH: loop header
LB: loop body
LE: loop exit
PB: predicated region body
PF: predicated region fallthrough
CT: control target
= control target key end

     0   :  { %6 = vsyncpa [#allocation3], 0  ;;  %s145_s0 = inlined_call_operand.hbm [shape: f32[8,256], index: 0, kind: input, shape index: {}]   ;;  %s146_s1 = inlined_call_operand.hbm [shape: f32[8,256], index: 1, kind: output, shape index: {}]  }
   0x1   :  { %7 = vsyncpa [#allocation4], 0  ;;  %s109_s6 = smov [#allocation2]   ;;  %s61_s10 = scalar_lea.hbm %s145_s0, 256 }
   0x2   :  { %s14_s7 = sshll.u32 %s109_s6, 4  ;;  %p62_p0 = scmp.ne.s32.totalorder %s145_s0, %s61_s10  ;;  %s15_s7 = int_to_ptr.vmem [resolvable:$true] %s14_s7 }
   0x3   :  { %p65_p1 = scmp.lt.u32.totalorder %s61_s10, %s145_s0 }
   0x5   :  { %p67_p2 = pnand %p65_p1, %p62_p0 }
   0x7   :  { %70 = shalt.err (!%p67_p2)
}
   0x8   :  { %s71_s15 = scalar_lea.vmem %s15_s7, 256  ;;  %p76_p4 = scmp.lt.s32.totalorder %s15_s7, %s15_s7 }
   0x9   :  { %p72_p3 = scmp.ne.s32.totalorder %s15_s7, %s71_s15  ;;  %p77_p5 = scmp.lt.s32.totalorder %s71_s15, %s71_s15 }
   0xb   :  { %p78_p6 = por %p77_p5, %p76_p4 }
   0xd   :  { %p79_p7 = pnand %p78_p6, %p72_p3 }
   0xf   :  { %82 = shalt.err (!%p79_p7)
}
  0x10   :  { %17 = dma.hbm_to_vmem [thread:$0]  %s145_s0, 256, %s15_s7, [#allocation3]  }
  0x11   :  { %105 = dma.done.wait [#allocation3], 256  }
  0x12   :  { %106 = vsyncadd [#allocation3], 4294967040  ;;  %v21_v0 = vld [vmem:[#allocation2] sm:$0xff]  ;;  %v22_v1 = vld [vmem:[#allocation2 + $0x8] sm:$0xff]  ;;  %s110_s18 = smov [#allocation5]  }
  0x13   :  { %v23_v2 = vadd.f32 %v22_v1, %v21_v0  ;;  %s48_s0 = sshll.u32 %s110_s18, 4  ;;  %s49_s0 = int_to_ptr.vmem [resolvable:$true] %s48_s0 }
  0x14   :  { %s83_s19 = scalar_lea.vmem %s49_s0, 256  ;;  %p88_p9 = scmp.lt.s32.totalorder %s49_s0, %s49_s0 }
  0x15   :  { %24 = vadd.xlane.f32.xlu0 %v23_v2  ;;  %p84_p8 = scmp.ne.s32.totalorder %s49_s0, %s83_s19  ;;  %p89_p10 = scmp.lt.s32.totalorder %s83_s19, %s83_s19 }
  0x17   :  { %p90_p11 = por %p89_p10, %p88_p9 }
  0x19   :  { %p91_p12 = pnand %p90_p11, %p84_p8 }
  0xa2   :  { %v25_v3 = vpop.xlane.xlu0 %24 }
  0xa3   :  { %v27_v4 = vmul.f32 0.00390625, %v25_v3 }
  0xa5   :  { %v28_v5 = vsub.f32 %v21_v0, %v27_v4  ;;  %v29_v6 = vsub.f32 %v22_v1, %v27_v4 }
  0xa7   :  { %v30_v7 = vmul.f32 %v28_v5, %v28_v5  ;;  %v31_v8 = vmul.f32 %v29_v6, %v29_v6 }
  0xa9   :  { %v32_v9 = vadd.f32 %v31_v8, %v30_v7 }
  0xab   :  { %33 = vadd.xlane.f32.xlu0 %v32_v9 }
 0x138   :  { %v34_v10 = vpop.xlane.xlu0 %33 }
 0x139   :  { %v35_v11 = vmul.f32 0.00390625, %v34_v10 }
 0x13b   :  { %v36_v12 = vadd.f32 1e-08, %v35_v11 }
 0x13d   :  { %59 = vrsqrt.f32 %v36_v12 }
 0x147   :  { %v60_v13 = vpop.eup %59 }
 0x148   :  { %v38_v14 = vmul.f32 %v60_v13, %v28_v5  ;;  %v39_v15 = vmul.f32 %v60_v13, %v29_v6 }
 0x14a   :  { %40 = vst [vmem:[#allocation5] sm:$0xff] %v38_v14  ;;  %41 = vst [vmem:[#allocation5 + $0x8] sm:$0xff] %v39_v15 }
 0x14b   :  { %94 = shalt.err (!%p91_p12)
}
 0x14c   :  { %s95_s22 = scalar_lea.hbm %s146_s1, 256 }
 0x14d   :  { %p96_p13 = scmp.ne.s32.totalorder %s146_s1, %s95_s22  ;;  %p99_p0 = scmp.lt.u32.totalorder %s95_s22, %s146_s1 }
 0x14f   :  { %p101_p1 = pnand %p99_p0, %p96_p13 }
 0x151   :  { %104 = shalt.err (!%p101_p1)
}
 0x152   :  { %51 = dma.vmem_to_hbm [thread:$0]  %s49_s0, 256, %s146_s1, [#allocation4]  }
 0x153   :  { %107 = dma.done.wait [#allocation4], 256  }
 0x154   :  { %108 = vsyncadd [#allocation4], 4294967040 }
 0x155   :  { %55 = vsyncpa [#allocation3], 1 }
 0x156   :  { %56 = vsyncpa [#allocation4], 1 }

</bundles_post_ra>
